<compile_context>
chip_gen: v6e
topology: v6e:2x2x1
jax: 0.10.0
libtpu: 0.0.40
codegen_flags: <defaults>
</compile_context>

<pallas_src>
import jax
import jax.numpy as jnp
import numpy as np
from jax.experimental import pallas as pl
from jax.experimental.pallas import tpu as pltpu

_MIB = 1024 * 1024


def _round_up(v: int, m: int) -> int:
    return -(-v // m) * m


# ---------------------------------------------------------------------------
# Kernels
# ---------------------------------------------------------------------------

def _lsep_binary_kernel(x_ref, t_ref, out_ref):
    """Binary-target fast path: O(C) work per row, no pairwise intermediate."""
    x = x_ref[...].astype(jnp.float32)                       # (TB, C)
    t = t_ref[...]                                           # native dtype

    # torch.where(isnan, 0, .) ; torch.where(isinf, 0, .) -> one fused select.
    x = jnp.where(jnp.isfinite(x), x, jnp.float32(0.0))

    neg_mask = t == 0                                        # "negatives" (t_j = 0)
    pos_mask = jnp.logical_not(neg_mask)                     # "positives" (t_i = 1)
    ninf = jnp.float32(-jnp.inf)

    # A = logsumexp over negatives of x
    xn = jnp.where(neg_mask, x, ninf)
    mn = jnp.max(xn, axis=1, keepdims=True)                  # -inf if no negatives
    mn_s = jnp.where(jnp.isfinite(mn), mn, jnp.float32(0.0))
    sn = jnp.sum(jnp.where(neg_mask, jnp.exp(x - mn_s), jnp.float32(0.0)),
                 axis=1, keepdims=True)

    # B = logsumexp over positives of -x
    xp = jnp.where(pos_mask, -x, ninf)
    mp = jnp.max(xp, axis=1, keepdims=True)                  # -inf if no positives
    mp_s = jnp.where(jnp.isfinite(mp), mp, jnp.float32(0.0))
    sp = jnp.sum(jnp.where(pos_mask, jnp.exp(-x - mp_s), jnp.float32(0.0)),
                 axis=1, keepdims=True)

    # z = A + B; an empty positive/negative set gives log(0) = -inf -> lsep = 0.
    z = mn_s + mp_s + jnp.log(sn * sp)
    lsep = jnp.where(z > 0.0,
                     z + jnp.log(1.0 + jnp.exp(-z)),
                     jnp.log(1.0 + jnp.exp(z)))              # stable log(1 + e^z)

    # Lane-dense store: one (1, TB) row per grid step.
    out_ref[...] = jnp.transpose(lsep)


def _make_lsep_general_kernel(i_chunk: int):
    """General (non-binary target) fallback.

    acc[b, j] = sum_i [t[b, j] < t[b, i]] * exp(m_b - x[b, i]) is accumulated
    over i with plain VPU adds of (TB, C) slabs (i is the leading axis of each
    (ic, TB, C) select), leaving a single final lane reduce of acc * exp(x - m).
    The i axis is chunked so the live working set is bounded independent of C.

    NOTE: like the PyTorch reference at extreme (cleaned) logit spreads (> ~88
    in f32), exp(m - x_i) can overflow to +inf; documented divergence only.
    """

    def kernel(x_ref, t_ref, out_ref):
        x = x_ref[...].astype(jnp.float32)                   # (TB, C)
        t = t_ref[...]                                       # native dtype
        x = jnp.where(jnp.isfinite(x), x, jnp.float32(0.0))

        tb, c = x.shape
        m = jnp.max(x, axis=1, keepdims=True)                # (TB, 1)
        e_pos = jnp.exp(x - m)                               # exp(x_j - m)
        e_neg = jnp.exp(m - x)                               # exp(m - x_i)

        # One-time small transposes so i-chunks are leading-axis slices.
        t_t = jnp.transpose(t)                               # (C, TB)
        en_t = jnp.transpose(e_neg)                          # (C, TB)

        acc = jnp.zeros((tb, c), jnp.float32)
        for start in range(0, c, i_chunk):                   # static trip count
            stop = min(start + i_chunk, c)
            t_i = t_t[start:stop][:, :, None]                # (ic, TB, 1), free slice
            e_i = en_t[start:stop][:, :, None]               # (ic, TB, 1)
            contrib = jnp.where(t[None, :, :] < t_i, e_i, jnp.float32(0.0))
            acc = acc + jnp.sum(contrib, axis=0)             # leading axis: VPU adds

        s = jnp.sum(acc * e_pos, axis=1, keepdims=True)      # single lane reduce
        out_ref[...] = jnp.transpose(jnp.log(1.0 + s))       # lane-dense (1, TB)

    return kernel


# ---------------------------------------------------------------------------
# Sizing heuristics
# ---------------------------------------------------------------------------

def _vmem_limit_bytes() -> int:
    """~Half of the per-core physical VMEM: 64 MiB on v5e/v6e, 32 MiB on v7x.
    Passed explicitly so we never rely on the 16/32 MiB scoped defaults."""
    try:
        cap = int(pltpu.get_tpu_info().vmem_capacity_bytes)
    except Exception:   # off-TPU tracing / older jax: v7x worst case
        cap = 64 * _MIB
    return max(16 * _MIB, cap // 2)


def _choose_batch_tile(B: int, C: int, binary: bool, vmem_limit: int) -> int:
    """Per-row working-set model:
      inputs (2 arrays x 2 pipeline buffers x 4B)      : ~16*C bytes/row
      f32 kernel temporaries (x, masks, exps, ...)     : ~40*C bytes/row
      general path: + minimum (8, TB, C) select slabs  : ~96*C bytes/row
    sized against ~3/4 of the scoped-VMEM limit."""
    per_row = C * (56 if binary else 152)
    budget = (vmem_limit * 3) // 4
    tb = budget // max(per_row, 1)
    tb = int(max(8, min(tb, 2048)))
    tb -= tb % 8
    b_pad8 = _round_up(B, 8)
    tb = min(tb, b_pad8)
    # v7x has 2 TensorCores: keep >= 2 parallel grid steps whenever the batch
    # can actually be split, so both cores get work.
    if b_pad8 > 8 and tb >= b_pad8:
        tb = max(8, _round_up((B + 1) // 2, 8))
    return tb


def _choose_i_chunk(C: int, batch_tile: int, vmem_limit: int) -> int:
    """General path only: bound the live (i_chunk, TB, C) slabs (~3 of them)."""
    slab_budget = max(4 * _MIB, vmem_limit // 4)
    ic = slab_budget // max(batch_tile * C * 4 * 3, 1)
    ic = int(max(8, min(ic, C)))
    ic -= ic % 8
    return max(8, ic)


def _targets_are_binary(target) -> bool:
    """Static detection: bool dtype, or a concrete array whose values are {0,1}."""
    if target.dtype == jnp.bool_:
        return True
    try:
        tv = np.asarray(target)        # raises on tracers -> general path
    except Exception:
        return False
    return bool(np.all((tv == 0) | (tv == 1)))


# ---------------------------------------------------------------------------
# Wrapper
# ---------------------------------------------------------------------------

def lsep_loss(logit: jax.Array, target: jax.Array, *, average: bool = True,
              binary_targets: bool | None = None,
              batch_tile: int | None = None):
    assert logit.ndim == 2 and target.shape == logit.shape
    B, C = logit.shape

    if binary_targets is None:
        binary_targets = _targets_are_binary(target)

    vmem_limit = _vmem_limit_bytes()
    if batch_tile is None:
        batch_tile = _choose_batch_tile(B, C, binary_targets, vmem_limit)
    batch_tile = max(8, _round_up(int(batch_tile), 8))

    # Pad the batch. Padded rows (x = 0, t = 0) have an empty positive set, so
    # their lsep is exactly log(1 + 0) = 0 and they contribute nothing.
    B_pad = _round_up(B, batch_tile)
    if B_pad != B:
        pad = B_pad - B
        logit = jnp.pad(logit, ((0, pad), (0, 0)))
        target = jnp.pad(target, ((0, pad), (0, 0)))
    num_tiles = B_pad // batch_tile

    if binary_targets:
        kernel = _lsep_binary_kernel
    else:
        kernel = _make_lsep_general_kernel(
            _choose_i_chunk(C, batch_tile, vmem_limit))

    per_tile = pl.pallas_call(
        kernel,
        out_shape=jax.ShapeDtypeStruct((num_tiles, batch_tile), jnp.float32),
        grid_spec=pltpu.PrefetchScalarGridSpec(
            num_scalar_prefetch=0,
            grid=(num_tiles,),
            in_specs=[
                pl.BlockSpec((batch_tile, C), lambda i: (i, 0)),
                pl.BlockSpec((batch_tile, C), lambda i: (i, 0)),
            ],
            out_specs=pl.BlockSpec((1, batch_tile), lambda i: (i, 0)),
        ),
        compiler_params=pltpu.CompilerParams(
            dimension_semantics=("parallel",),   # independent tiles -> megacore
            vmem_limit_bytes=int(vmem_limit),
        ),
    )(logit, target)

    if average:
        # Padded rows are exactly zero; divide by the true batch size.
        return (jnp.sum(per_tile) / jnp.float32(B)).astype(jnp.float32)
    return per_tile.reshape(-1)[:B]


def lsep_loss_forward(inputs: dict, target: jax.Array) -> jax.Array:
    """Equivalent of LSEPLoss.forward: inputs is a dict with key 'logit'."""
    return lsep_loss(inputs["logit"], target, average=True)


# ---------------------------------------------------------------------------
# Pure-JAX reference mirror (for the in-script sanity check)
# ---------------------------------------------------------------------------

def _reference_loss(logit, target):
    x = logit.astype(jnp.float32)
    x = jnp.where(jnp.isnan(x), 0.0, x)
    x = jnp.where(jnp.isinf(x), 0.0, x)
    t = target.astype(jnp.float32)
    diff = x[:, None, :] - x[:, :, None]
    wd = (t[:, None, :] < t[:, :, None]).astype(jnp.float32)
    exps = jnp.exp(diff) * wd
    lsep = jnp.log(1.0 + exps.sum(axis=2).sum(axis=1))
    return lsep.mean()


if __name__ == "__main__":
    key = jax.random.PRNGKey(0)
    k1, k2, k3 = jax.random.split(key, 3)

    B, C = 8, 24  # small multi-label setup: (batch, num_classes)

    logits = jax.random.normal(k1, (B, C), dtype=jnp.float32) * 2.0
    # Inject NaN / +-Inf entries to exercise the cleaning path.
    logits = logits.at[0, 0].set(jnp.nan)
    logits = logits.at[1, 3].set(jnp.inf)
    logits = logits.at[2, 5].set(-jnp.inf)

    # Standard multi-label (binary {0,1}) targets -> exercises the O(C) fast path.
    target_bin = (jax.random.uniform(k2, (B, C)) > 0.5).astype(jnp.int32)
    out_bin = lsep_loss_forward({"logit": logits}, target_bin)
    jax.block_until_ready(out_bin)
    ref_bin = _reference_loss(logits, target_bin)
    assert jnp.allclose(out_bin, ref_bin, rtol=1e-4, atol=1e-5), (out_bin, ref_bin)

    # Multi-level targets -> exercises the general pairwise fallback kernel.
    target_lvl = jax.random.randint(k3, (B, C), 0, 3)
    out_lvl = lsep_loss(logits, target_lvl, average=True)
    jax.block_until_ready(out_lvl)
    ref_lvl = _reference_loss(logits, target_lvl)
    assert jnp.allclose(out_lvl, ref_lvl, rtol=1e-4, atol=1e-5), (out_lvl, ref_lvl)

    print("KERNEL_OK")
</pallas_src>

<mosaic_0001>
module attributes {stable_mosaic.version = 11 : i64} {
  func.func @_lsep_binary_kernel(%arg0: i32, %arg1: memref<8x24xf32, #tpu.memory_space<vmem>>, %arg2: memref<8x24xi32, #tpu.memory_space<vmem>>, %arg3: memref<1x8xf32, #tpu.memory_space<vmem>>) attributes {dimension_semantics = [#tpu.dimension_semantics<parallel>], iteration_bounds = array<i64: 1>, scalar_prefetch = 0 : i64, scratch_operands = 0 : i64, tpu.core_type = #tpu.core_type<tc>, window_params = [{transform_indices = @transform_0, window_bounds = array<i64: 8, 24>}, {transform_indices = @transform_1, window_bounds = array<i64: 8, 24>}, {transform_indices = @transform_2, window_bounds = array<i64: 1, 8>}]} {
    %c0 = arith.constant 0 : index
    %c0_0 = arith.constant 0 : index
    %0 = vector.load %arg1[%c0, %c0_0] : memref<8x24xf32, #tpu.memory_space<vmem>>, vector<8x24xf32>
    %c0_1 = arith.constant 0 : index
    %c0_2 = arith.constant 0 : index
    %1 = vector.load %arg2[%c0_1, %c0_2] : memref<8x24xi32, #tpu.memory_space<vmem>>, vector<8x24xi32>
    %2 = tpu.weird %0 : vector<8x24xf32> -> vector<8x24xi1>
    %cst = arith.constant dense<true> : vector<8x24xi1>
    %3 = arith.xori %2, %cst : vector<8x24xi1>
    %cst_3 = arith.constant 0.000000e+00 : f32
    %4 = vector.broadcast %cst_3 : f32 to vector<8x24xf32>
    %5 = arith.select %3, %0, %4 : vector<8x24xi1>, vector<8x24xf32>
    %c0_i32 = arith.constant 0 : i32
    %6 = vector.broadcast %c0_i32 : i32 to vector<8x24xi32>
    %7 = arith.cmpi eq, %1, %6 : vector<8x24xi32>
    %cst_4 = arith.constant dense<true> : vector<8x24xi1>
    %8 = arith.xori %7, %cst_4 : vector<8x24xi1>
    %cst_5 = arith.constant 0xFF800000 : f32
    %9 = vector.broadcast %cst_5 : f32 to vector<8x24xf32>
    %10 = arith.select %7, %5, %9 : vector<8x24xi1>, vector<8x24xf32>
    %cst_6 = arith.constant dense<0xFF800000> : vector<8xf32>
    %11 = vector.multi_reduction <maximumf>, %10, %cst_6 [1] : vector<8x24xf32> to vector<8xf32>
    %12 = vector.shape_cast %11 : vector<8xf32> to vector<8x1xf32>
    %13 = tpu.weird %12 : vector<8x1xf32> -> vector<8x1xi1>
    %cst_7 = arith.constant dense<true> : vector<8x1xi1>
    %14 = arith.xori %13, %cst_7 : vector<8x1xi1>
    %cst_8 = arith.constant 0.000000e+00 : f32
    %15 = vector.broadcast %cst_8 : f32 to vector<8x1xf32>
    %16 = arith.select %14, %12, %15 : vector<8x1xi1>, vector<8x1xf32>
    %17 = vector.broadcast %16 : vector<8x1xf32> to vector<8x24xf32>
    %18 = arith.subf %5, %17 : vector<8x24xf32>
    %19 = math.exp %18 : vector<8x24xf32>
    %cst_9 = arith.constant 0.000000e+00 : f32
    %20 = vector.broadcast %cst_9 : f32 to vector<8x24xf32>
    %21 = arith.select %7, %19, %20 : vector<8x24xi1>, vector<8x24xf32>
    %cst_10 = arith.constant dense<0.000000e+00> : vector<8xf32>
    %22 = vector.multi_reduction <add>, %21, %cst_10 [1] : vector<8x24xf32> to vector<8xf32>
    %23 = vector.shape_cast %22 : vector<8xf32> to vector<8x1xf32>
    %cst_11 = arith.constant 0.000000e+00 : f32
    %24 = vector.broadcast %cst_11 : f32 to vector<8x24xf32>
    %25 = arith.subf %24, %5 : vector<8x24xf32>
    %cst_12 = arith.constant 0xFF800000 : f32
    %26 = vector.broadcast %cst_12 : f32 to vector<8x24xf32>
    %27 = arith.select %8, %25, %26 : vector<8x24xi1>, vector<8x24xf32>
    %cst_13 = arith.constant dense<0xFF800000> : vector<8xf32>
    %28 = vector.multi_reduction <maximumf>, %27, %cst_13 [1] : vector<8x24xf32> to vector<8xf32>
    %29 = vector.shape_cast %28 : vector<8xf32> to vector<8x1xf32>
    %30 = tpu.weird %29 : vector<8x1xf32> -> vector<8x1xi1>
    %cst_14 = arith.constant dense<true> : vector<8x1xi1>
    %31 = arith.xori %30, %cst_14 : vector<8x1xi1>
    %cst_15 = arith.constant 0.000000e+00 : f32
    %32 = vector.broadcast %cst_15 : f32 to vector<8x1xf32>
    %33 = arith.select %31, %29, %32 : vector<8x1xi1>, vector<8x1xf32>
    %cst_16 = arith.constant 0.000000e+00 : f32
    %34 = vector.broadcast %cst_16 : f32 to vector<8x24xf32>
    %35 = arith.subf %34, %5 : vector<8x24xf32>
    %36 = vector.broadcast %33 : vector<8x1xf32> to vector<8x24xf32>
    %37 = arith.subf %35, %36 : vector<8x24xf32>
    %38 = math.exp %37 : vector<8x24xf32>
    %cst_17 = arith.constant 0.000000e+00 : f32
    %39 = vector.broadcast %cst_17 : f32 to vector<8x24xf32>
    %40 = arith.select %8, %38, %39 : vector<8x24xi1>, vector<8x24xf32>
    %cst_18 = arith.constant dense<0.000000e+00> : vector<8xf32>
    %41 = vector.multi_reduction <add>, %40, %cst_18 [1] : vector<8x24xf32> to vector<8xf32>
    %42 = vector.shape_cast %41 : vector<8xf32> to vector<8x1xf32>
    %43 = arith.addf %16, %33 : vector<8x1xf32>
    %44 = arith.mulf %23, %42 : vector<8x1xf32>
    %45 = math.log %44 : vector<8x1xf32>
    %46 = arith.addf %43, %45 : vector<8x1xf32>
    %cst_19 = arith.constant 0.000000e+00 : f32
    %47 = vector.broadcast %cst_19 : f32 to vector<8x1xf32>
    %48 = arith.cmpf ogt, %46, %47 : vector<8x1xf32>
    %cst_20 = arith.constant 0.000000e+00 : f32
    %49 = vector.broadcast %cst_20 : f32 to vector<8x1xf32>
    %50 = arith.subf %49, %46 : vector<8x1xf32>
    %51 = math.exp %50 : vector<8x1xf32>
    %cst_21 = arith.constant 1.000000e+00 : f32
    %52 = vector.broadcast %cst_21 : f32 to vector<8x1xf32>
    %53 = arith.addf %52, %51 : vector<8x1xf32>
    %54 = math.log %53 : vector<8x1xf32>
    %55 = arith.addf %46, %54 : vector<8x1xf32>
    %56 = math.exp %46 : vector<8x1xf32>
    %cst_22 = arith.constant 1.000000e+00 : f32
    %57 = vector.broadcast %cst_22 : f32 to vector<8x1xf32>
    %58 = arith.addf %57, %56 : vector<8x1xf32>
    %59 = math.log %58 : vector<8x1xf32>
    %60 = arith.select %48, %55, %59 : vector<8x1xi1>, vector<8x1xf32>
    %61 = tpu.transpose %60, [1, 0] : vector<8x1xf32> -> vector<1x8xf32>
    %c0_23 = arith.constant 0 : index
    %c0_24 = arith.constant 0 : index
    %62 = vector.load %arg3[%c0_23, %c0_24] : memref<1x8xf32, #tpu.memory_space<vmem>>, vector<1x8xf32>
    tpu.vector_store %arg3[%c0_23, %c0_24], %61 {strides = array<i32>} : memref<1x8xf32, #tpu.memory_space<vmem>>, vector<1x8xf32>,
    return
  }
  func.func @transform_0(%arg0: i32) -> (i32, i32) {
    %c0_i32 = arith.constant 0 : i32
    %c0_i32_0 = arith.constant 0 : i32
    return %arg0, %c0_i32 : i32, i32
  }
  func.func @transform_1(%arg0: i32) -> (i32, i32) {
    %c0_i32 = arith.constant 0 : i32
    %c0_i32_0 = arith.constant 0 : i32
    return %arg0, %c0_i32 : i32, i32
  }
  func.func @transform_2(%arg0: i32) -> (i32, i32) {
    %c0_i32 = arith.constant 0 : i32
    %c0_i32_0 = arith.constant 0 : i32
    return %arg0, %c0_i32 : i32, i32
  }
}

</mosaic_0001>

<bundles_post_ra>
// kernel: tpu_custom_call.1
= control target key start
LH: loop header
LB: loop body
LE: loop exit
PB: predicated region body
PF: predicated region fallthrough
CT: control target
= control target key end

     0   :  { %7 = vsyncpa [#allocation3], 0  ;;  %s274_s0 = inlined_call_operand.hbm [shape: f32[8,24], index: 0, kind: input, shape index: {}]   ;;  %s275_s1 = inlined_call_operand.hbm [shape: s32[8,24], index: 1, kind: input, shape index: {}]   ;;  %s276_s2 = inlined_call_operand.hbm [shape: f32[1,8], index: 2, kind: output, shape index: {}]  }
   0x1   :  { %8 = vsyncpa [#allocation6], 0 }
   0x2   :  { %9 = vsyncpa [#allocation4], 0  ;;  %s227_s9 = smov [#allocation2]   ;;  %s228_s11 = smov [#allocation5]  }
   0x3   :  { %s16_s10 = sshll.u32 %s227_s9, 4  ;;  %s26_s12 = sshll.u32 %s228_s11, 4  ;;  %s17_s10 = int_to_ptr.vmem [resolvable:$true] %s16_s10  ;;  %s27_s12 = int_to_ptr.vmem [resolvable:$true] %s26_s12 }
   0x4   :  { %s169_s13 = scalar_lea.vmem %s17_s10, 128  ;;  %p174_p1 = scmp.lt.s32.totalorder %s17_s10, %s17_s10 }
   0x5   :  { %p170_p0 = scmp.ne.s32.totalorder %s17_s10, %s169_s13  ;;  %p175_p2 = scmp.lt.s32.totalorder %s169_s13, %s169_s13 }
   0x7   :  { %p176_p3 = por %p175_p2, %p174_p1 }
   0x9   :  { %p177_p4 = pnand %p176_p3, %p170_p0 }
   0xb   :  { %180 = shalt.err (!%p177_p4)
}
   0xc   :  { %19 = dma.hbm_to_vmem [thread:$0]  %s274_s0, 128, %s17_s10, [#allocation3]  }
   0xd   :  { %s189_s16 = scalar_lea.vmem %s27_s12, 128  ;;  %p194_p6 = scmp.lt.s32.totalorder %s27_s12, %s27_s12 }
   0xe   :  { %p190_p5 = scmp.ne.s32.totalorder %s27_s12, %s189_s16  ;;  %p195_p7 = scmp.lt.s32.totalorder %s189_s16, %s189_s16 }
  0x10   :  { %p196_p8 = por %p195_p7, %p194_p6 }
  0x12   :  { %p197_p9 = pnand %p196_p8, %p190_p5 }
  0x14   :  { %200 = shalt.err (!%p197_p9)
}
  0x15   :  { %29 = dma.hbm_to_vmem [thread:$0]  %s275_s1, 128, %s27_s12, [#allocation6]  }
  0x16   :  { %221 = dma.done.wait [#allocation3], 128  }
  0x17   :  { %222 = vsyncadd [#allocation3], 4294967168 }
  0x18   :  { %223 = dma.done.wait [#allocation6], 128  }
  0x19   :  { %224 = vsyncadd [#allocation6], 4294967168  ;;  %v36_v0 = vld [vmem:[#allocation2] sm:$0xff]  ;;  %v37_v1 = vld [vmem:[#allocation5] sm:$0xff]  ;;  %vm229_vm2 = vmmov 1   ;;  %vm44_vm4 = vcmask 195584  }
  0x1a   :  { %vm38_vm0 = vweird.f32 %v36_v0  ;;  %vm41_vm1 = vcmp.eq.s32.totalorder %v37_v1, 0  ;;  %s230_s0 = smov [#allocation7]   ;;  %vm124_vm11 = vcmask 57344  }
  0x1b   :  { %vm39_vm3 = vmxor %vm38_vm0, %vm229_vm2  ;;  %s132_s1 = sshll.u32 %s230_s0, 4  ;;  %s133_s1 = int_to_ptr.vmem [resolvable:$true] %s132_s1 }
  0x1c   :  { %v40_v2 = vsel %vm39_vm3, %v36_v0, 0.0  ;;  %vm255_vm5 = vmxor %vm41_vm1, %vm229_vm2  ;;  %s201_s19 = scalar_lea.vmem %s133_s1, 16  ;;  %s205_s20 = scalar_lea.vmem %s133_s1, 32 }
  0x1d   :  { %v43_v4 = vsel %vm41_vm1, %v40_v2, -inf  ;;  %v58_v5 = vsub.f32 0.0, %v40_v2  ;;  %p202_p10 = scmp.ne.s32.totalorder %s133_s1, %s201_s19  ;;  %p206_p11 = scmp.lt.s32.totalorder %s133_s1, %s133_s1 }
  0x1e   :  { %v45_v6 = vsel %vm44_vm4, %v43_v4, -inf  ;;  %p207_p12 = scmp.lt.s32.totalorder %s205_s20, %s201_s19 }
  0x1f   :  { %46 = vmax.xlane.f32.xlu0 %v45_v6  ;;  %v59_v7 = vsel %vm255_vm5, %v58_v5, -inf }
  0x20   :  { %v60_v8 = vsel %vm44_vm4, %v59_v7, -inf  ;;  %p208_p13 = por %p207_p12, %p206_p11 }
  0x22   :  { %p209_p0 = pnand %p208_p13, %p202_p10 }
  0x23   :  { %61 = vmax.xlane.f32.xlu0 %v60_v8 }
  0xa8   :  { %v47_v9 = vpop.xlane.xlu0 %46 }
  0xa9   :  { %vm48_vm6 = vweird.f32 %v47_v9 }
  0xaa   :  { %vm49_vm7 = vmxor %vm48_vm6, %vm229_vm2 }
  0xab   :  { %v50_v10 = vsel %vm49_vm7, %v47_v9, 0.0 }
  0xac   :  { %v51_v11 = vsub.f32 %v40_v2, %v50_v10  ;;  %v62_v12 = vpop.xlane.xlu0 %61 }
  0xad   :  { %vm63_vm8 = vweird.f32 %v62_v12 }
  0xae   :  { %v52_v13 = vmul.f32 1.442695, %v51_v11  ;;  %vm64_vm9 = vmxor %vm63_vm8, %vm229_vm2 }
  0xaf   :  { %v65_v14 = vsel %vm64_vm9, %v62_v12, 0.0 }
  0xb0   :  { %147 = vpow2.f32 %v52_v13  ;;  %v66_v15 = vsub.f32 %v58_v5, %v65_v14  ;;  %v73_v16 = vadd.f32 %v65_v14, %v50_v10 }
  0xb2   :  { %v67_v17 = vmul.f32 1.442695, %v66_v15 }
  0xb4   :  { %149 = vpow2.f32 %v67_v17 }
  0xbd   :  { %v148_v18 = vpop.eup %147 }
  0xbe   :  { %v54_v19 = vsel %vm41_vm1, %v148_v18, 0.0 }
  0xbf   :  { %v55_v20 = vsel %vm44_vm4, %v54_v19, 0.0 }
  0xc0   :  { %56 = vadd.xlane.f32.xlu1 %v55_v20 }
  0xc1   :  { %v150_v21 = vpop.eup %149 }
  0xc2   :  { %v69_v22 = vsel %vm255_vm5, %v150_v21, 0.0 }
  0xc3   :  { %v70_v23 = vsel %vm44_vm4, %v69_v22, 0.0 }
  0xc4   :  { %71 = vadd.xlane.f32.xlu1 %v70_v23 }
 0x149   :  { %v57_v24 = vpop.xlane.xlu1 %56 }
 0x14d   :  { %v72_v25 = vpop.xlane.xlu1 %71 }
 0x14e   :  { %v74_v26 = vmul.f32 %v72_v25, %v57_v24 }
 0x150   :  { %151 = vlog2.f32 %v74_v26 }
 0x15d   :  { %v152_v27 = vpop.eup %151 }
 0x15e   :  { %v76_v28 = vmul.f32 0.6931472, %v152_v27 }
 0x160   :  { %v77_v29 = vadd.f32 %v76_v28, %v73_v16 }
 0x162   :  { %v79_v30 = vsub.f32 0.0, %v77_v29  ;;  %v86_v31 = vmul.f32 1.442695, %v77_v29  ;;  %vm78_vm10 = vcmp.gt.f32.partialorder %v77_v29, 0.0 }
 0x164   :  { %v80_v32 = vmul.f32 1.442695, %v79_v30  ;;  %153 = vpow2.f32 %v86_v31 }
 0x166   :  { %155 = vpow2.f32 %v80_v32 }
 0x171   :  { %v154_v33 = vpop.eup %153 }
 0x172   :  { %v88_v34 = vadd.f32 1.0, %v154_v33 }
 0x173   :  { %v156_v35 = vpop.eup %155 }
 0x174   :  { %v82_v36 = vadd.f32 1.0, %v156_v35  ;;  %157 = vlog2.f32 %v88_v34 }
 0x176   :  { %159 = vlog2.f32 %v82_v36 }
 0x181   :  { %v158_v37 = vpop.eup %157 }
 0x182   :  { %v90_v41 = vmul.f32 0.6931472, %v158_v37 }
 0x183   :  { %v160_v38 = vpop.eup %159 }
 0x184   :  { %v84_v39 = vmul.f32 0.6931472, %v160_v38 }
 0x186   :  { %v85_v40 = vadd.f32 %v84_v39, %v77_v29 }
 0x188   :  { %v91_v42 = vsel %vm78_vm10, %v85_v40, %v90_v41 }
 0x189   :  { %92 = vxpose.xlu0.b32.start.end [1/1] (short) (narrow) %v91_v42, 8 }
 0x205   :  { %v108_v43 = vpop.trf.xlu0 }
 0x206   :  { %125 = vst.msk [vmem:[#allocation7] sm:$0x1] %vm124_vm11, %v108_v43 }
 0x207   :  { %212 = shalt.err (!%p209_p0)
}
 0x208   :  { %135 = dma.vmem_to_hbm [thread:$0]  %s133_s1, 16, %s276_s2, [#allocation4]  }
 0x209   :  { %225 = dma.done.wait [#allocation4], 16  }
 0x20a   :  { %226 = vsyncadd [#allocation4], 4294967280 }
 0x20b   :  { %139 = vsyncpa [#allocation3], 1 }
 0x20c   :  { %140 = vsyncpa [#allocation6], 1 }
 0x20d   :  { %141 = vsyncpa [#allocation4], 1 }

</bundles_post_ra>
